<compile_context>
chip_gen: v7x
topology: tpu7x:2x2x1
jax: 0.10.0
libtpu: 0.0.40
codegen_flags: <defaults>
</compile_context>

<pallas_src>
import functools

import jax
import jax.numpy as jnp
from jax import lax
from jax.experimental import pallas as pl
from jax.experimental.pallas import tpu as pltpu

NEG_INF = -1e30
LANE_PAD = 128  # lane-dense output padding (last output dim)


def _beam_kernel(len_ref, logits_ref, idx_ref, score_ref,
                 topv_ref, topi_ref, beam_ref, *, K, V, T, LP):
    """One batch row per grid step.

    len_ref    : SMEM (B,) int32           (scalar-prefetched lengths)
    logits_ref : VMEM (1, T, V)            (raw scores for this batch row)
    idx_ref    : VMEM (1, T, LP) int32     (flat candidate index per step/beam)
    score_ref  : VMEM (1, K, LP) float32   (final beam log-prob scores, lane-bcast)
    topv_ref   : VMEM (T, K) float32       scratch: per-step top-K raw scores
    topi_ref   : VMEM (T, K) int32         scratch: per-step top-K token ids
    beam_ref   : VMEM (K, 1) float32       scratch: beam raw-score accumulator
    """
    b = pl.program_id(0)
    length = len_ref[b]
    n_steps = jnp.minimum(jnp.maximum(length, 0), T)

    x = logits_ref[0].astype(jnp.float32)                       # (T, V)

    # Per-step softmax normalizer (log-sum-exp); selection itself runs on raw
    # scores because the normalizer is constant across all K*V candidates.
    m = jnp.max(x, axis=-1, keepdims=True)                      # (T, 1)
    lse = m + jnp.log(jnp.sum(jnp.exp(x - m), axis=-1, keepdims=True))  # (T, 1)

    # Stage 1: batched per-timestep top-K over the vocab (lanes).  The per-row
    # ordering of `beam_k + x_t[v]` along v is identical for every beam, so the
    # global top-K at each step only ever needs these K tokens.
    col = lax.broadcasted_iota(jnp.int32, (T, V), 1)
    laneK = lax.broadcasted_iota(jnp.int32, (T, K), 1)
    topv = jnp.full((T, K), NEG_INF, jnp.float32)
    topi = jnp.zeros((T, K), jnp.int32)
    c = x
    for j in range(K):                                          # K small & static
        mx = jnp.max(c, axis=-1, keepdims=True)                 # (T, 1)
        idx = jnp.min(jnp.where(c == mx, col, jnp.int32(V)),
                      axis=-1, keepdims=True)                   # (T, 1) first argmax
        topv = jnp.where(laneK == j, mx, topv)
        topi = jnp.where(laneK == j, idx, topi)
        c = jnp.where(col == idx, NEG_INF, c)
    topv_ref[...] = topv
    topi_ref[...] = topi

    # Pre-fill output with the "padded timestep" value: parent = k, token = 0
    # (flat index k * V), so steps t >= length need no masking at all.
    idx_ref[...] = lax.broadcasted_iota(jnp.int32, (1, T, LP), 2) * V

    # Beam 0 starts at 0, the others at -inf.
    beam_ref[...] = jnp.where(
        lax.broadcasted_iota(jnp.int32, (K, 1), 0) == 0, 0.0, NEG_INF
    ).astype(jnp.float32)

    # Loop-invariant iotas (hoisted; JAX does not CSE broadcast_in_dim).
    krow = lax.broadcasted_iota(jnp.int32, (K, K), 0)           # parent beam id
    kcol = lax.broadcasted_iota(jnp.int32, (K, 1), 0)
    lane = lax.broadcasted_iota(jnp.int32, (1, LP), 1)
    sentinel = jnp.int32(K * V)

    # Stage 2: data-dependent trip count — only the valid timesteps run.
    @pl.loop(0, n_steps)
    def _(t):
        tv = topv_ref[pl.ds(t, 1), :]                           # (1, K)
        ti = topi_ref[pl.ds(t, 1), :]                           # (1, K)
        beam = beam_ref[...]                                    # (K, 1)
        cand = beam + tv                                        # (K, K) joint raw scores
        flat = krow * V + ti                                    # (K, K) flat candidate id

        row = lane * V                                          # default pad for lanes >= K
        new_beam = jnp.full((K, 1), NEG_INF, jnp.float32)
        c2 = cand
        for j in range(K):                                      # iterative top-K on (K, K)
            mx = jnp.max(c2, keepdims=True)                     # (1, 1)
            fidx = jnp.min(jnp.where(c2 == mx, flat, sentinel),
                           keepdims=True)                       # (1, 1) first argmax
            row = jnp.where(lane == j, fidx, row)
            new_beam = jnp.where(kcol == j, mx, new_beam)
            c2 = jnp.where(flat == fidx, NEG_INF, c2)

        beam_ref[...] = new_beam
        idx_ref[:, pl.ds(t, 1), :] = row[None]                  # lane-dense row store

    # Final log-prob scores = accumulated raw scores - accumulated normalizers.
    trow = lax.broadcasted_iota(jnp.int32, (T, 1), 0)
    norm = jnp.sum(jnp.where(trow < n_steps, lse, 0.0), keepdims=True)  # (1, 1)
    final = beam_ref[...] - norm                                # (K, 1)
    score_ref[...] = jnp.broadcast_to(final[None], (1, K, LP))


def _backtrace(flat_idx, vocab_size):
    """Plain-JAX parent-pointer backtrace.

    flat_idx: (B, T, K) int32, flat candidate index = parent * V + token.
    """
    parents = flat_idx // vocab_size
    tokens = flat_idx % vocab_size
    B, T, K = tokens.shape
    beam_idx = jnp.broadcast_to(jnp.arange(K, dtype=jnp.int32)[None, :], (B, K))
    seqs = jnp.zeros((B, K, T), jnp.int32)
    for t in range(T - 1, -1, -1):
        tok_t = jnp.take_along_axis(tokens[:, t, :], beam_idx, axis=1)
        seqs = seqs.at[:, :, t].set(tok_t)
        beam_idx = jnp.take_along_axis(parents[:, t, :], beam_idx, axis=1)
    return seqs


def beam_search_decode(predicts, lengths, beamsize):
    """predicts: (B, T, V), lengths: (B,) int32 →
    ((B, K, T) int32 token sequences, (B, K) float32 scores), beams best-first."""
    B, T, V = predicts.shape
    K = beamsize
    if K > V:
        raise ValueError(f"beamsize ({K}) must be <= vocab size ({V})")
    if K > LANE_PAD:
        raise ValueError(f"beamsize ({K}) must be <= {LANE_PAD}")
    LP = LANE_PAD

    kernel = functools.partial(_beam_kernel, K=K, V=V, T=T, LP=LP)

    grid_spec = pltpu.PrefetchScalarGridSpec(
        num_scalar_prefetch=1,
        grid=(B,),
        in_specs=[pl.BlockSpec((1, T, V), lambda b, lens: (b, 0, 0))],
        out_specs=[
            pl.BlockSpec((1, T, LP), lambda b, lens: (b, 0, 0)),
            pl.BlockSpec((1, K, LP), lambda b, lens: (b, 0, 0)),
        ],
        scratch_shapes=[
            pltpu.VMEM((T, K), jnp.float32),   # per-step top-K scores
            pltpu.VMEM((T, K), jnp.int32),     # per-step top-K token ids
            pltpu.VMEM((K, 1), jnp.float32),   # beam score accumulator
        ],
    )

    itemsize = jnp.dtype(predicts.dtype).itemsize
    vmem_need = 2 * (T * V * itemsize + T * LP * 4 + K * LP * 4) + (2 << 20)
    cp_kwargs = dict(dimension_semantics=("parallel",))
    if vmem_need > (16 << 20):
        # TODO(synk): for very large T*V (e.g. 32k vocab) tile over T (or chunk
        # V with a local top-K merge) instead of only raising the VMEM limit —
        # v7x has just 64 MiB of VMEM.
        cp_kwargs["vmem_limit_bytes"] = int(min(vmem_need, 64 << 20))

    cost = pl.CostEstimate(
        flops=int(2 * B * T * V * (K + 2)),
        transcendentals=int(B * T * (V + 1)),
        bytes_accessed=int(B * T * V * itemsize + B * (T + K) * LP * 4 + B * 4),
    )

    flat_idx, scores = pl.pallas_call(
        kernel,
        out_shape=(
            jax.ShapeDtypeStruct((B, T, LP), jnp.int32),
            jax.ShapeDtypeStruct((B, K, LP), jnp.float32),
        ),
        grid_spec=grid_spec,
        compiler_params=pltpu.CompilerParams(**cp_kwargs),
        cost_estimate=cost,
    )(lengths.astype(jnp.int32), predicts)

    seqs = _backtrace(flat_idx[:, :, :K], V)     # (B, K, T)
    return seqs, scores[:, :, 0]                 # (B, K, T), (B, K)


class Seq2SeqBeamsearchDecoder:
    """JAX/Pallas analogue of the PyTorch Seq2SeqBeamsearchDecoder.

    No learnable parameters (the PyTorch module only stores `model`, `vocab`
    and `beamsize`); nothing to initialize beyond the beam width.
    """

    def __init__(self, beamsize: int):
        self.beamsize = beamsize

    def __call__(self, predicts, lengths):
        return beam_search_decode(predicts, lengths, self.beamsize)


if __name__ == "__main__":
    key = jax.random.PRNGKey(0)
    B, T, V = 2, 8, 32        # batch, sequence length, vocab size
    beamsize = 4

    predicts = jax.random.normal(key, (B, T, V), dtype=jnp.float32)
    lengths = jnp.array([8, 5], dtype=jnp.int32)

    decoder = Seq2SeqBeamsearchDecoder(beamsize)
    seqs, scores = decoder(predicts, lengths)
    jax.block_until_ready((seqs, scores))

    assert seqs.shape == (B, beamsize, T)
    assert scores.shape == (B, beamsize)
    print("KERNEL_OK")
</pallas_src>

<mosaic_0001>
module attributes {stable_mosaic.version = 11 : i64} {
  func.func @_beam_kernel(%arg0: i32, %arg1: memref<2xi32, #tpu.memory_space<smem>>, %arg2: memref<1x8x32xf32, #tpu.memory_space<vmem>>, %arg3: memref<1x8x128xi32, #tpu.memory_space<vmem>>, %arg4: memref<1x4x128xf32, #tpu.memory_space<vmem>>, %arg5: memref<8x4xf32, #tpu.memory_space<vmem>>, %arg6: memref<8x4xi32, #tpu.memory_space<vmem>>, %arg7: memref<4x1xf32, #tpu.memory_space<vmem>>) attributes {dimension_semantics = [#tpu.dimension_semantics<parallel>], iteration_bounds = array<i64: 2>, scalar_prefetch = 1 : i64, scratch_operands = 3 : i64, tpu.core_type = #tpu.core_type<tc>, window_params = [{transform_indices = @transform_0, window_bounds = array<i64: 1, 8, 32>}, {transform_indices = @transform_1, window_bounds = array<i64: 1, 8, 128>}, {transform_indices = @transform_2, window_bounds = array<i64: 1, 4, 128>}]} {
    %0 = arith.index_cast %arg0 : i32 to index
    %1 = memref.load %arg1[%0] : memref<2xi32, #tpu.memory_space<smem>>
    %c0_i32 = arith.constant 0 : i32
    %2 = arith.maxsi %1, %c0_i32 : i32
    %c8_i32 = arith.constant 8 : i32
    %3 = arith.minsi %2, %c8_i32 : i32
    %c0 = arith.constant 0 : index
    %c0_0 = arith.constant 0 : index
    %c0_1 = arith.constant 0 : index
    %4 = vector.load %arg2[%c0, %c0_0, %c0_1] : memref<1x8x32xf32, #tpu.memory_space<vmem>>, vector<1x8x32xf32>
    %5 = vector.shape_cast %4 : vector<1x8x32xf32> to vector<8x32xf32>
    %cst = arith.constant dense<0xFF800000> : vector<8xf32>
    %6 = vector.multi_reduction <maximumf>, %5, %cst [1] : vector<8x32xf32> to vector<8xf32>
    %7 = vector.shape_cast %6 : vector<8xf32> to vector<8x1xf32>
    %8 = vector.broadcast %7 : vector<8x1xf32> to vector<8x32xf32>
    %9 = arith.subf %5, %8 : vector<8x32xf32>
    %10 = math.exp %9 : vector<8x32xf32>
    %cst_2 = arith.constant dense<0.000000e+00> : vector<8xf32>
    %11 = vector.multi_reduction <add>, %10, %cst_2 [1] : vector<8x32xf32> to vector<8xf32>
    %12 = vector.shape_cast %11 : vector<8xf32> to vector<8x1xf32>
    %13 = math.log %12 : vector<8x1xf32>
    %14 = arith.addf %7, %13 : vector<8x1xf32>
    %15 = tpu.iota {dimensions = array<i32: 1>} : vector<8x32xi32>
    %16 = tpu.iota {dimensions = array<i32: 1>} : vector<8x4xi32>
    %cst_3 = arith.constant -1.000000e+30 : f32
    %17 = vector.broadcast %cst_3 : f32 to vector<8x4xf32>
    %c0_i32_4 = arith.constant 0 : i32
    %18 = vector.broadcast %c0_i32_4 : i32 to vector<8x4xi32>
    %cst_5 = arith.constant dense<0xFF800000> : vector<8xf32>
    %19 = vector.multi_reduction <maximumf>, %5, %cst_5 [1] : vector<8x32xf32> to vector<8xf32>
    %20 = vector.shape_cast %19 : vector<8xf32> to vector<8x1xf32>
    %21 = vector.broadcast %20 : vector<8x1xf32> to vector<8x32xf32>
    %22 = arith.cmpf oeq, %5, %21 : vector<8x32xf32>
    %c32_i32 = arith.constant 32 : i32
    %23 = vector.broadcast %c32_i32 : i32 to vector<8x32xi32>
    %24 = arith.select %22, %15, %23 : vector<8x32xi1>, vector<8x32xi32>
    %cst_6 = arith.constant dense<2147483647> : vector<8xi32>
    %25 = vector.multi_reduction <minsi>, %24, %cst_6 [1] : vector<8x32xi32> to vector<8xi32>
    %26 = vector.shape_cast %25 : vector<8xi32> to vector<8x1xi32>
    %c0_i32_7 = arith.constant 0 : i32
    %27 = vector.broadcast %c0_i32_7 : i32 to vector<8x4xi32>
    %28 = arith.cmpi eq, %16, %27 : vector<8x4xi32>
    %29 = vector.shape_cast %20 : vector<8x1xf32> to vector<8x1xf32>
    %30 = vector.broadcast %29 : vector<8x1xf32> to vector<8x4xf32>
    %31 = arith.select %28, %30, %17 : vector<8x4xi1>, vector<8x4xf32>
    %c0_i32_8 = arith.constant 0 : i32
    %32 = vector.broadcast %c0_i32_8 : i32 to vector<8x4xi32>
    %33 = arith.cmpi eq, %16, %32 : vector<8x4xi32>
    %34 = vector.shape_cast %26 : vector<8x1xi32> to vector<8x1xi32>
    %35 = vector.broadcast %34 : vector<8x1xi32> to vector<8x4xi32>
    %36 = arith.select %33, %35, %18 : vector<8x4xi1>, vector<8x4xi32>
    %37 = vector.broadcast %26 : vector<8x1xi32> to vector<8x32xi32>
    %38 = arith.cmpi eq, %15, %37 : vector<8x32xi32>
    %cst_9 = arith.constant -1.000000e+30 : f32
    %39 = vector.broadcast %cst_9 : f32 to vector<8x32xf32>
    %40 = arith.select %38, %39, %5 : vector<8x32xi1>, vector<8x32xf32>
    %cst_10 = arith.constant dense<0xFF800000> : vector<8xf32>
    %41 = vector.multi_reduction <maximumf>, %40, %cst_10 [1] : vector<8x32xf32> to vector<8xf32>
    %42 = vector.shape_cast %41 : vector<8xf32> to vector<8x1xf32>
    %43 = vector.broadcast %42 : vector<8x1xf32> to vector<8x32xf32>
    %44 = arith.cmpf oeq, %40, %43 : vector<8x32xf32>
    %c32_i32_11 = arith.constant 32 : i32
    %45 = vector.broadcast %c32_i32_11 : i32 to vector<8x32xi32>
    %46 = arith.select %44, %15, %45 : vector<8x32xi1>, vector<8x32xi32>
    %cst_12 = arith.constant dense<2147483647> : vector<8xi32>
    %47 = vector.multi_reduction <minsi>, %46, %cst_12 [1] : vector<8x32xi32> to vector<8xi32>
    %48 = vector.shape_cast %47 : vector<8xi32> to vector<8x1xi32>
    %c1_i32 = arith.constant 1 : i32
    %49 = vector.broadcast %c1_i32 : i32 to vector<8x4xi32>
    %50 = arith.cmpi eq, %16, %49 : vector<8x4xi32>
    %51 = vector.shape_cast %42 : vector<8x1xf32> to vector<8x1xf32>
    %52 = vector.broadcast %51 : vector<8x1xf32> to vector<8x4xf32>
    %53 = arith.select %50, %52, %31 : vector<8x4xi1>, vector<8x4xf32>
    %c1_i32_13 = arith.constant 1 : i32
    %54 = vector.broadcast %c1_i32_13 : i32 to vector<8x4xi32>
    %55 = arith.cmpi eq, %16, %54 : vector<8x4xi32>
    %56 = vector.shape_cast %48 : vector<8x1xi32> to vector<8x1xi32>
    %57 = vector.broadcast %56 : vector<8x1xi32> to vector<8x4xi32>
    %58 = arith.select %55, %57, %36 : vector<8x4xi1>, vector<8x4xi32>
    %59 = vector.broadcast %48 : vector<8x1xi32> to vector<8x32xi32>
    %60 = arith.cmpi eq, %15, %59 : vector<8x32xi32>
    %cst_14 = arith.constant -1.000000e+30 : f32
    %61 = vector.broadcast %cst_14 : f32 to vector<8x32xf32>
    %62 = arith.select %60, %61, %40 : vector<8x32xi1>, vector<8x32xf32>
    %cst_15 = arith.constant dense<0xFF800000> : vector<8xf32>
    %63 = vector.multi_reduction <maximumf>, %62, %cst_15 [1] : vector<8x32xf32> to vector<8xf32>
    %64 = vector.shape_cast %63 : vector<8xf32> to vector<8x1xf32>
    %65 = vector.broadcast %64 : vector<8x1xf32> to vector<8x32xf32>
    %66 = arith.cmpf oeq, %62, %65 : vector<8x32xf32>
    %c32_i32_16 = arith.constant 32 : i32
    %67 = vector.broadcast %c32_i32_16 : i32 to vector<8x32xi32>
    %68 = arith.select %66, %15, %67 : vector<8x32xi1>, vector<8x32xi32>
    %cst_17 = arith.constant dense<2147483647> : vector<8xi32>
    %69 = vector.multi_reduction <minsi>, %68, %cst_17 [1] : vector<8x32xi32> to vector<8xi32>
    %70 = vector.shape_cast %69 : vector<8xi32> to vector<8x1xi32>
    %c2_i32 = arith.constant 2 : i32
    %71 = vector.broadcast %c2_i32 : i32 to vector<8x4xi32>
    %72 = arith.cmpi eq, %16, %71 : vector<8x4xi32>
    %73 = vector.shape_cast %64 : vector<8x1xf32> to vector<8x1xf32>
    %74 = vector.broadcast %73 : vector<8x1xf32> to vector<8x4xf32>
    %75 = arith.select %72, %74, %53 : vector<8x4xi1>, vector<8x4xf32>
    %c2_i32_18 = arith.constant 2 : i32
    %76 = vector.broadcast %c2_i32_18 : i32 to vector<8x4xi32>
    %77 = arith.cmpi eq, %16, %76 : vector<8x4xi32>
    %78 = vector.shape_cast %70 : vector<8x1xi32> to vector<8x1xi32>
    %79 = vector.broadcast %78 : vector<8x1xi32> to vector<8x4xi32>
    %80 = arith.select %77, %79, %58 : vector<8x4xi1>, vector<8x4xi32>
    %81 = vector.broadcast %70 : vector<8x1xi32> to vector<8x32xi32>
    %82 = arith.cmpi eq, %15, %81 : vector<8x32xi32>
    %cst_19 = arith.constant -1.000000e+30 : f32
    %83 = vector.broadcast %cst_19 : f32 to vector<8x32xf32>
    %84 = arith.select %82, %83, %62 : vector<8x32xi1>, vector<8x32xf32>
    %cst_20 = arith.constant dense<0xFF800000> : vector<8xf32>
    %85 = vector.multi_reduction <maximumf>, %84, %cst_20 [1] : vector<8x32xf32> to vector<8xf32>
    %86 = vector.shape_cast %85 : vector<8xf32> to vector<8x1xf32>
    %87 = vector.broadcast %86 : vector<8x1xf32> to vector<8x32xf32>
    %88 = arith.cmpf oeq, %84, %87 : vector<8x32xf32>
    %c32_i32_21 = arith.constant 32 : i32
    %89 = vector.broadcast %c32_i32_21 : i32 to vector<8x32xi32>
    %90 = arith.select %88, %15, %89 : vector<8x32xi1>, vector<8x32xi32>
    %cst_22 = arith.constant dense<2147483647> : vector<8xi32>
    %91 = vector.multi_reduction <minsi>, %90, %cst_22 [1] : vector<8x32xi32> to vector<8xi32>
    %92 = vector.shape_cast %91 : vector<8xi32> to vector<8x1xi32>
    %c3_i32 = arith.constant 3 : i32
    %93 = vector.broadcast %c3_i32 : i32 to vector<8x4xi32>
    %94 = arith.cmpi eq, %16, %93 : vector<8x4xi32>
    %95 = vector.shape_cast %86 : vector<8x1xf32> to vector<8x1xf32>
    %96 = vector.broadcast %95 : vector<8x1xf32> to vector<8x4xf32>
    %97 = arith.select %94, %96, %75 : vector<8x4xi1>, vector<8x4xf32>
    %c3_i32_23 = arith.constant 3 : i32
    %98 = vector.broadcast %c3_i32_23 : i32 to vector<8x4xi32>
    %99 = arith.cmpi eq, %16, %98 : vector<8x4xi32>
    %100 = vector.shape_cast %92 : vector<8x1xi32> to vector<8x1xi32>
    %101 = vector.broadcast %100 : vector<8x1xi32> to vector<8x4xi32>
    %102 = arith.select %99, %101, %80 : vector<8x4xi1>, vector<8x4xi32>
    %c0_24 = arith.constant 0 : index
    %c0_25 = arith.constant 0 : index
    %103 = vector.load %arg5[%c0_24, %c0_25] : memref<8x4xf32, #tpu.memory_space<vmem>>, vector<8x4xf32>
    tpu.vector_store %arg5[%c0_24, %c0_25], %97 {strides = array<i32>} : memref<8x4xf32, #tpu.memory_space<vmem>>, vector<8x4xf32>,
    %c0_26 = arith.constant 0 : index
    %c0_27 = arith.constant 0 : index
    %104 = vector.load %arg6[%c0_26, %c0_27] : memref<8x4xi32, #tpu.memory_space<vmem>>, vector<8x4xi32>
    tpu.vector_store %arg6[%c0_26, %c0_27], %102 {strides = array<i32>} : memref<8x4xi32, #tpu.memory_space<vmem>>, vector<8x4xi32>,
    %105 = tpu.iota {dimensions = array<i32: 2>} : vector<1x8x128xi32>
    %c32_i32_28 = arith.constant 32 : i32
    %106 = vector.broadcast %c32_i32_28 : i32 to vector<1x8x128xi32>
    %107 = arith.muli %105, %106 : vector<1x8x128xi32>
    %c0_29 = arith.constant 0 : index
    %c0_30 = arith.constant 0 : index
    %c0_31 = arith.constant 0 : index
    %108 = vector.load %arg3[%c0_29, %c0_30, %c0_31] : memref<1x8x128xi32, #tpu.memory_space<vmem>>, vector<1x8x128xi32>
    tpu.vector_store %arg3[%c0_29, %c0_30, %c0_31], %107 {strides = array<i32>} : memref<1x8x128xi32, #tpu.memory_space<vmem>>, vector<1x8x128xi32>,
    %109 = tpu.iota {dimensions = array<i32: 0>} : vector<4x1xi32>
    %c0_i32_32 = arith.constant 0 : i32
    %110 = vector.broadcast %c0_i32_32 : i32 to vector<4x1xi32>
    %111 = arith.cmpi eq, %109, %110 : vector<4x1xi32>
    %cst_33 = arith.constant 0.000000e+00 : f32
    %cst_34 = arith.constant -1.000000e+30 : f32
    %112 = vector.broadcast %cst_33 : f32 to vector<4x1xf32>
    %113 = vector.broadcast %cst_34 : f32 to vector<4x1xf32>
    %114 = arith.select %111, %112, %113 : vector<4x1xi1>, vector<4x1xf32>
    %c0_35 = arith.constant 0 : index
    %c0_36 = arith.constant 0 : index
    %115 = vector.load %arg7[%c0_35, %c0_36] : memref<4x1xf32, #tpu.memory_space<vmem>>, vector<4x1xf32>
    tpu.vector_store %arg7[%c0_35, %c0_36], %114 {strides = array<i32>} : memref<4x1xf32, #tpu.memory_space<vmem>>, vector<4x1xf32>,
    %116 = tpu.iota {dimensions = array<i32: 0>} : vector<4x4xi32>
    %117 = tpu.iota {dimensions = array<i32: 0>} : vector<4x1xi32>
    %118 = tpu.iota {dimensions = array<i32: 1>} : vector<1x128xi32>
    %c0_i32_37 = arith.constant 0 : i32
    %119 = arith.subi %3, %c0_i32_37 : i32
    %c1_i32_38 = arith.constant 1 : i32
    %c1_i32_39 = arith.constant 1 : i32
    %120 = arith.subi %c1_i32_38, %c1_i32_39 : i32
    %121 = arith.addi %119, %120 : i32
    %c1_i32_40 = arith.constant 1 : i32
    %122 = arith.divsi %121, %c1_i32_40 : i32
    %c1_i32_41 = arith.constant 1 : i32
    %c0_i32_42 = arith.constant 0 : i32
    %c128_i32 = arith.constant 128 : i32
    %c0_i32_43 = arith.constant 0 : i32
    %123 = arith.subi %122, %c0_i32_43 : i32
    %124 = arith.addi %c0_i32_43, %123 : i32
    %c1_i32_44 = arith.constant 1 : i32
    scf.for %arg8 = %c0_i32_43 to %124 step %c1_i32_44  : i32 {
      %142 = arith.muli %arg8, %c1_i32_41 : i32
      %143 = arith.addi %c0_i32_42, %142 : i32
      %144 = arith.index_cast %143 : i32 to index
      %c0_52 = arith.constant 0 : index
      %145 = vector.load %arg5[%144, %c0_52] : memref<8x4xf32, #tpu.memory_space<vmem>>, vector<1x4xf32>
      %146 = arith.index_cast %143 : i32 to index
      %c0_53 = arith.constant 0 : index
      %147 = vector.load %arg6[%146, %c0_53] : memref<8x4xi32, #tpu.memory_space<vmem>>, vector<1x4xi32>
      %c0_54 = arith.constant 0 : index
      %c0_55 = arith.constant 0 : index
      %148 = vector.load %arg7[%c0_54, %c0_55] : memref<4x1xf32, #tpu.memory_space<vmem>>, vector<4x1xf32>
      %149 = vector.broadcast %148 : vector<4x1xf32> to vector<4x4xf32>
      %150 = vector.broadcast %145 : vector<1x4xf32> to vector<4x4xf32>
      %151 = arith.addf %149, %150 : vector<4x4xf32>
      %c32_i32_56 = arith.constant 32 : i32
      %152 = vector.broadcast %c32_i32_56 : i32 to vector<4x4xi32>
      %153 = arith.muli %116, %152 : vector<4x4xi32>
      %154 = vector.broadcast %147 : vector<1x4xi32> to vector<4x4xi32>
      %155 = arith.addi %153, %154 : vector<4x4xi32>
      %c32_i32_57 = arith.constant 32 : i32
      %156 = vector.broadcast %c32_i32_57 : i32 to vector<1x128xi32>
      %157 = arith.muli %118, %156 : vector<1x128xi32>
      %cst_58 = arith.constant -1.000000e+30 : f32
      %158 = vector.broadcast %cst_58 : f32 to vector<4x1xf32>
      %159 = vector.shape_cast %151 : vector<4x4xf32> to vector<1x4x4xf32>
      %cst_59 = arith.constant dense<0xFF800000> : vector<1xf32>
      %160 = vector.multi_reduction <maximumf>, %159, %cst_59 [1, 2] : vector<1x4x4xf32> to vector<1xf32>
      %161 = vector.shape_cast %160 : vector<1xf32> to vector<1x1x1xf32>
      %162 = vector.extract %161[0, 0, 0] : f32 from vector<1x1x1xf32>
      %163 = vector.broadcast %162 : f32 to vector<1x1xf32>
      %164 = vector.broadcast %163 : vector<1x1xf32> to vector<4x4xf32>
      %165 = arith.cmpf oeq, %151, %164 : vector<4x4xf32>
      %166 = vector.broadcast %c128_i32 : i32 to vector<4x4xi32>
      %167 = arith.select %165, %155, %166 : vector<4x4xi1>, vector<4x4xi32>
      %168 = vector.shape_cast %167 : vector<4x4xi32> to vector<1x4x4xi32>
      %cst_60 = arith.constant dense<2147483647> : vector<1xi32>
      %169 = vector.multi_reduction <minsi>, %168, %cst_60 [1, 2] : vector<1x4x4xi32> to vector<1xi32>
      %170 = vector.shape_cast %169 : vector<1xi32> to vector<1x1x1xi32>
      %171 = vector.extract %170[0, 0, 0] : i32 from vector<1x1x1xi32>
      %172 = vector.broadcast %171 : i32 to vector<1x1xi32>
      %c0_i32_61 = arith.constant 0 : i32
      %173 = vector.broadcast %c0_i32_61 : i32 to vector<1x128xi32>
      %174 = arith.cmpi eq, %118, %173 : vector<1x128xi32>
      %175 = vector.shape_cast %172 : vector<1x1xi32> to vector<1x1xi32>
      %176 = vector.broadcast %175 : vector<1x1xi32> to vector<1x128xi32>
      %177 = arith.select %174, %176, %157 : vector<1x128xi1>, vector<1x128xi32>
      %c0_i32_62 = arith.constant 0 : i32
      %178 = vector.broadcast %c0_i32_62 : i32 to vector<4x1xi32>
      %179 = arith.cmpi eq, %117, %178 : vector<4x1xi32>
      %180 = vector.shape_cast %163 : vector<1x1xf32> to vector<1x1xf32>
      %181 = vector.broadcast %180 : vector<1x1xf32> to vector<4x1xf32>
      %182 = arith.select %179, %181, %158 : vector<4x1xi1>, vector<4x1xf32>
      %183 = vector.broadcast %172 : vector<1x1xi32> to vector<4x4xi32>
      %184 = arith.cmpi eq, %155, %183 : vector<4x4xi32>
      %cst_63 = arith.constant -1.000000e+30 : f32
      %185 = vector.broadcast %cst_63 : f32 to vector<4x4xf32>
      %186 = arith.select %184, %185, %151 : vector<4x4xi1>, vector<4x4xf32>
      %187 = vector.shape_cast %186 : vector<4x4xf32> to vector<1x4x4xf32>
      %cst_64 = arith.constant dense<0xFF800000> : vector<1xf32>
      %188 = vector.multi_reduction <maximumf>, %187, %cst_64 [1, 2] : vector<1x4x4xf32> to vector<1xf32>
      %189 = vector.shape_cast %188 : vector<1xf32> to vector<1x1x1xf32>
      %190 = vector.extract %189[0, 0, 0] : f32 from vector<1x1x1xf32>
      %191 = vector.broadcast %190 : f32 to vector<1x1xf32>
      %192 = vector.broadcast %191 : vector<1x1xf32> to vector<4x4xf32>
      %193 = arith.cmpf oeq, %186, %192 : vector<4x4xf32>
      %194 = vector.broadcast %c128_i32 : i32 to vector<4x4xi32>
      %195 = arith.select %193, %155, %194 : vector<4x4xi1>, vector<4x4xi32>
      %196 = vector.shape_cast %195 : vector<4x4xi32> to vector<1x4x4xi32>
      %cst_65 = arith.constant dense<2147483647> : vector<1xi32>
      %197 = vector.multi_reduction <minsi>, %196, %cst_65 [1, 2] : vector<1x4x4xi32> to vector<1xi32>
      %198 = vector.shape_cast %197 : vector<1xi32> to vector<1x1x1xi32>
      %199 = vector.extract %198[0, 0, 0] : i32 from vector<1x1x1xi32>
      %200 = vector.broadcast %199 : i32 to vector<1x1xi32>
      %c1_i32_66 = arith.constant 1 : i32
      %201 = vector.broadcast %c1_i32_66 : i32 to vector<1x128xi32>
      %202 = arith.cmpi eq, %118, %201 : vector<1x128xi32>
      %203 = vector.shape_cast %200 : vector<1x1xi32> to vector<1x1xi32>
      %204 = vector.broadcast %203 : vector<1x1xi32> to vector<1x128xi32>
      %205 = arith.select %202, %204, %177 : vector<1x128xi1>, vector<1x128xi32>
      %c1_i32_67 = arith.constant 1 : i32
      %206 = vector.broadcast %c1_i32_67 : i32 to vector<4x1xi32>
      %207 = arith.cmpi eq, %117, %206 : vector<4x1xi32>
      %208 = vector.shape_cast %191 : vector<1x1xf32> to vector<1x1xf32>
      %209 = vector.broadcast %208 : vector<1x1xf32> to vector<4x1xf32>
      %210 = arith.select %207, %209, %182 : vector<4x1xi1>, vector<4x1xf32>
      %211 = vector.broadcast %200 : vector<1x1xi32> to vector<4x4xi32>
      %212 = arith.cmpi eq, %155, %211 : vector<4x4xi32>
      %cst_68 = arith.constant -1.000000e+30 : f32
      %213 = vector.broadcast %cst_68 : f32 to vector<4x4xf32>
      %214 = arith.select %212, %213, %186 : vector<4x4xi1>, vector<4x4xf32>
      %215 = vector.shape_cast %214 : vector<4x4xf32> to vector<1x4x4xf32>
      %cst_69 = arith.constant dense<0xFF800000> : vector<1xf32>
      %216 = vector.multi_reduction <maximumf>, %215, %cst_69 [1, 2] : vector<1x4x4xf32> to vector<1xf32>
      %217 = vector.shape_cast %216 : vector<1xf32> to vector<1x1x1xf32>
      %218 = vector.extract %217[0, 0, 0] : f32 from vector<1x1x1xf32>
      %219 = vector.broadcast %218 : f32 to vector<1x1xf32>
      %220 = vector.broadcast %219 : vector<1x1xf32> to vector<4x4xf32>
      %221 = arith.cmpf oeq, %214, %220 : vector<4x4xf32>
      %222 = vector.broadcast %c128_i32 : i32 to vector<4x4xi32>
      %223 = arith.select %221, %155, %222 : vector<4x4xi1>, vector<4x4xi32>
      %224 = vector.shape_cast %223 : vector<4x4xi32> to vector<1x4x4xi32>
      %cst_70 = arith.constant dense<2147483647> : vector<1xi32>
      %225 = vector.multi_reduction <minsi>, %224, %cst_70 [1, 2] : vector<1x4x4xi32> to vector<1xi32>
      %226 = vector.shape_cast %225 : vector<1xi32> to vector<1x1x1xi32>
      %227 = vector.extract %226[0, 0, 0] : i32 from vector<1x1x1xi32>
      %228 = vector.broadcast %227 : i32 to vector<1x1xi32>
      %c2_i32_71 = arith.constant 2 : i32
      %229 = vector.broadcast %c2_i32_71 : i32 to vector<1x128xi32>
      %230 = arith.cmpi eq, %118, %229 : vector<1x128xi32>
      %231 = vector.shape_cast %228 : vector<1x1xi32> to vector<1x1xi32>
      %232 = vector.broadcast %231 : vector<1x1xi32> to vector<1x128xi32>
      %233 = arith.select %230, %232, %205 : vector<1x128xi1>, vector<1x128xi32>
      %c2_i32_72 = arith.constant 2 : i32
      %234 = vector.broadcast %c2_i32_72 : i32 to vector<4x1xi32>
      %235 = arith.cmpi eq, %117, %234 : vector<4x1xi32>
      %236 = vector.shape_cast %219 : vector<1x1xf32> to vector<1x1xf32>
      %237 = vector.broadcast %236 : vector<1x1xf32> to vector<4x1xf32>
      %238 = arith.select %235, %237, %210 : vector<4x1xi1>, vector<4x1xf32>
      %239 = vector.broadcast %228 : vector<1x1xi32> to vector<4x4xi32>
      %240 = arith.cmpi eq, %155, %239 : vector<4x4xi32>
      %cst_73 = arith.constant -1.000000e+30 : f32
      %241 = vector.broadcast %cst_73 : f32 to vector<4x4xf32>
      %242 = arith.select %240, %241, %214 : vector<4x4xi1>, vector<4x4xf32>
      %243 = vector.shape_cast %242 : vector<4x4xf32> to vector<1x4x4xf32>
      %cst_74 = arith.constant dense<0xFF800000> : vector<1xf32>
      %244 = vector.multi_reduction <maximumf>, %243, %cst_74 [1, 2] : vector<1x4x4xf32> to vector<1xf32>
      %245 = vector.shape_cast %244 : vector<1xf32> to vector<1x1x1xf32>
      %246 = vector.extract %245[0, 0, 0] : f32 from vector<1x1x1xf32>
      %247 = vector.broadcast %246 : f32 to vector<1x1xf32>
      %248 = vector.broadcast %247 : vector<1x1xf32> to vector<4x4xf32>
      %249 = arith.cmpf oeq, %242, %248 : vector<4x4xf32>
      %250 = vector.broadcast %c128_i32 : i32 to vector<4x4xi32>
      %251 = arith.select %249, %155, %250 : vector<4x4xi1>, vector<4x4xi32>
      %252 = vector.shape_cast %251 : vector<4x4xi32> to vector<1x4x4xi32>
      %cst_75 = arith.constant dense<2147483647> : vector<1xi32>
      %253 = vector.multi_reduction <minsi>, %252, %cst_75 [1, 2] : vector<1x4x4xi32> to vector<1xi32>
      %254 = vector.shape_cast %253 : vector<1xi32> to vector<1x1x1xi32>
      %255 = vector.extract %254[0, 0, 0] : i32 from vector<1x1x1xi32>
      %256 = vector.broadcast %255 : i32 to vector<1x1xi32>
      %c3_i32_76 = arith.constant 3 : i32
      %257 = vector.broadcast %c3_i32_76 : i32 to vector<1x128xi32>
      %258 = arith.cmpi eq, %118, %257 : vector<1x128xi32>
      %259 = vector.shape_cast %256 : vector<1x1xi32> to vector<1x1xi32>
      %260 = vector.broadcast %259 : vector<1x1xi32> to vector<1x128xi32>
      %261 = arith.select %258, %260, %233 : vector<1x128xi1>, vector<1x128xi32>
      %c3_i32_77 = arith.constant 3 : i32
      %262 = vector.broadcast %c3_i32_77 : i32 to vector<4x1xi32>
      %263 = arith.cmpi eq, %117, %262 : vector<4x1xi32>
      %264 = vector.shape_cast %247 : vector<1x1xf32> to vector<1x1xf32>
      %265 = vector.broadcast %264 : vector<1x1xf32> to vector<4x1xf32>
      %266 = arith.select %263, %265, %238 : vector<4x1xi1>, vector<4x1xf32>
      %267 = vector.broadcast %256 : vector<1x1xi32> to vector<4x4xi32>
      %268 = arith.cmpi eq, %155, %267 : vector<4x4xi32>
      %cst_78 = arith.constant -1.000000e+30 : f32
      %269 = vector.broadcast %cst_78 : f32 to vector<4x4xf32>
      %270 = arith.select %268, %269, %242 : vector<4x4xi1>, vector<4x4xf32>
      %c0_79 = arith.constant 0 : index
      %c0_80 = arith.constant 0 : index
      %271 = vector.load %arg7[%c0_79, %c0_80] : memref<4x1xf32, #tpu.memory_space<vmem>>, vector<4x1xf32>
      tpu.vector_store %arg7[%c0_79, %c0_80], %266 {strides = array<i32>} : memref<4x1xf32, #tpu.memory_space<vmem>>, vector<4x1xf32>,
      %272 = vector.shape_cast %261 : vector<1x128xi32> to vector<1x1x128xi32>
      %c0_81 = arith.constant 0 : index
      %273 = arith.index_cast %143 : i32 to index
      %c0_82 = arith.constant 0 : index
      %274 = vector.load %arg3[%c0_81, %273, %c0_82] : memref<1x8x128xi32, #tpu.memory_space<vmem>>, vector<1x1x128xi32>
      tpu.vector_store %arg3[%c0_81, %273, %c0_82], %272 {strides = array<i32>} : memref<1x8x128xi32, #tpu.memory_space<vmem>>, vector<1x1x128xi32>,
    }
    %125 = tpu.iota {dimensions = array<i32: 0>} : vector<8x1xi32>
    %126 = vector.broadcast %3 : i32 to vector<8x1xi32>
    %127 = arith.cmpi slt, %125, %126 : vector<8x1xi32>
    %cst_45 = arith.constant 0.000000e+00 : f32
    %128 = vector.broadcast %cst_45 : f32 to vector<8x1xf32>
    %129 = arith.select %127, %14, %128 : vector<8x1xi1>, vector<8x1xf32>
    %130 = vector.shape_cast %129 : vector<8x1xf32> to vector<1x8x1xf32>
    %cst_46 = arith.constant dense<0.000000e+00> : vector<1xf32>
    %131 = vector.multi_reduction <add>, %130, %cst_46 [1, 2] : vector<1x8x1xf32> to vector<1xf32>
    %132 = vector.shape_cast %131 : vector<1xf32> to vector<1x1x1xf32>
    %133 = vector.extract %132[0, 0, 0] : f32 from vector<1x1x1xf32>
    %134 = vector.broadcast %133 : f32 to vector<1x1xf32>
    %c0_47 = arith.constant 0 : index
    %c0_48 = arith.constant 0 : index
    %135 = vector.load %arg7[%c0_47, %c0_48] : memref<4x1xf32, #tpu.memory_space<vmem>>, vector<4x1xf32>
    %136 = vector.broadcast %134 : vector<1x1xf32> to vector<4x1xf32>
    %137 = arith.subf %135, %136 : vector<4x1xf32>
    %138 = vector.shape_cast %137 : vector<4x1xf32> to vector<1x4x1xf32>
    %139 = vector.shape_cast %138 : vector<1x4x1xf32> to vector<1x4x1xf32>
    %140 = vector.broadcast %139 : vector<1x4x1xf32> to vector<1x4x128xf32>
    %c0_49 = arith.constant 0 : index
    %c0_50 = arith.constant 0 : index
    %c0_51 = arith.constant 0 : index
    %141 = vector.load %arg4[%c0_49, %c0_50, %c0_51] : memref<1x4x128xf32, #tpu.memory_space<vmem>>, vector<1x4x128xf32>
    tpu.vector_store %arg4[%c0_49, %c0_50, %c0_51], %140 {strides = array<i32>} : memref<1x4x128xf32, #tpu.memory_space<vmem>>, vector<1x4x128xf32>,
    return
  }
  func.func @transform_0(%arg0: i32, %arg1: memref<2xi32, #tpu.memory_space<smem>>) -> (i32, i32, i32) {
    %c0_i32 = arith.constant 0 : i32
    %c0_i32_0 = arith.constant 0 : i32
    %c0_i32_1 = arith.constant 0 : i32
    return %arg0, %c0_i32, %c0_i32_0 : i32, i32, i32
  }
  func.func @transform_1(%arg0: i32, %arg1: memref<2xi32, #tpu.memory_space<smem>>) -> (i32, i32, i32) {
    %c0_i32 = arith.constant 0 : i32
    %c0_i32_0 = arith.constant 0 : i32
    %c0_i32_1 = arith.constant 0 : i32
    return %arg0, %c0_i32, %c0_i32_0 : i32, i32, i32
  }
  func.func @transform_2(%arg0: i32, %arg1: memref<2xi32, #tpu.memory_space<smem>>) -> (i32, i32, i32) {
    %c0_i32 = arith.constant 0 : i32
    %c0_i32_0 = arith.constant 0 : i32
    %c0_i32_1 = arith.constant 0 : i32
    return %arg0, %c0_i32, %c0_i32_0 : i32, i32, i32
  }
}

</mosaic_0001>

<bundles_post_ra>
// kernel: tpu_custom_call.1
= control target key start
LH: loop header
LB: loop body
LE: loop exit
PB: predicated region body
PF: predicated region fallthrough
CT: control target
= control target key end

     0   :  { %s1289_s0 = inlined_call_operand.hbm [shape: s32[2], index: 0, kind: input, shape index: {}]   ;;  %s1290_s1 = inlined_call_operand.hbm [shape: f32[2,8,32], index: 1, kind: input, shape index: {}]   ;;  %s1291_s2 = inlined_call_operand.hbm [shape: s32[2,8,128], index: 2, kind: output, shape index: {0}]   ;;  %s1292_s3 = inlined_call_operand.hbm [shape: f32[2,4,128], index: 3, kind: output, shape index: {1}]  }
   0x1   :  { %s783_s14 = scalar_lea.hbm %s1289_s0, 16 }
   0x2   :  { %p784_p0 = scmp.ne.s32.totalorder %s1289_s0, %s783_s14  ;;  %p787_p1 = scmp.lt.u32.totalorder %s783_s14, %s1289_s0 }
   0x4   :  { %p789_p2 = pnand %p787_p1, %p784_p0 }
   0x6   :  { %792 = shalt.err (!%p789_p2)  }
   0x7   :  { %s933_s19 = smov [#allocation6]  }
   0x8   :  { %10 = dma.hbm_to_smem %s1289_s0, 16, %s933_s19, [#allocation5] }
   0x9   :  { %899 = dma.done.wait [#allocation5], 16 }
   0xa   :  { %900 = vsyncadd [#allocation5], 4294967280 }
   0xb   :  { %12 = sfence }
   0xc   :  { %13 = vsyncpa [#allocation8], 0 }
   0xd   :  { %15 = vsyncpa [#allocation8 + $0x1], 0 }
   0xe   :  { %16 = vsyncpa [#allocation9], 0 }
   0xf   :  { %18 = vsyncpa [#allocation9 + $0x1], 0 }
  0x10   :  { %19 = vsyncpa [#allocation12], 0 }
  0x11   :  { %21 = vsyncpa [#allocation12 + $0x1], 0  ;;  %s972_s22 = smov 0   ;;  %s974_s23 = smov 0  }
  0x12   :  { %s976_s24 = smov 0   ;;  %s978_s25 = smov 0  }
  0x13 LB: > { %s993_s0 = sadd.s32 4294967295, %s927_s25   ;;  %s671_s26 = sadd.s32 4294967294, %s927_s25   ;;  %s927_s25 = sphi %s978_s25, %s1307_s25   ;;  %s923_s24 = sphi %s976_s24, %s1306_s24   ;;  %s919_s23 = sphi %s974_s23, %s1305_s23   ;;  %s915_s22 = sphi %s972_s22, %s1304_s22  }
  0x14   : > { %s997_s27 = sadd.s32 1, %s927_s25   ;;  %s34_s28 = sadd.s32 1, %s923_s24 }
  0x15   : > { %s31_s29 = ssub.s32 %s927_s25, %s997_s27  ;;  %p41_p3 = scmp.ne.s32.totalorder %s923_s24, %s919_s23 }
  0x16   : > { %p32_p4 = scmp.eq.s32.totalorder %s31_s29, 0  ;;  %p42_p5 = scmp.eq.s32.totalorder %s927_s25, 0 }
  0x17   : > { %p47_p6 = scmp.ne.s32.totalorder %s919_s23, %s915_s22  ;;  %p48_p7 = scmp.eq.s32.totalorder %s993_s0, 0 }
  0x18   : > { %s1009_s30 = scalar_select %p32_p4, %s923_s24, %s34_s28  }
  0x19   : > { %p1011_p8 = por %p42_p5, %p41_p3  ;;  %p1015_p9 = por %p48_p7, %p47_p6 }
  0x1a   : > { %p71_p10 = scmp.eq.s32.totalorder %s993_s0, 1  ;;  %p77_p11 = scmp.eq.s32.totalorder %s671_s26, 1 }
  0x1b   : > { %p731_p13 = scmp.lt.s32.totalorder %s927_s25, 2  ;;  %s123_s8 = sand.u32 1, %s923_s24  }
  0x1c   : > { %p1022_p0 = por %p71_p10, %p41_p3  ;;  %p1026_p1 = por %p77_p11, %p47_p6 }
  0x1d   : > { %s675_s9 = sshll.u32 %s927_s25, 7  ;;  %s674_s10 = sshll.u32 %s123_s8, 3 }
  0x1e   : > { %s1296_s6 = scalar_select %p1022_p0, 1, 0 }
  0x1f   : > { %s1297_s7 = scalar_select %p1026_p1, 1, 0 }
  0x20   : > { %s1035_s13 = scalar_lea.hbm %s1290_s1, %s675_s9  ;;  %s127_s14 = scalar_lea.vmem [#allocation7], %s674_s10 }
  0x21   : > { %s134_s15 = sshll.u32 %s127_s14, 4  ;;  %p1039_p2 = pnand %p731_p13, %p1011_p8  ;;  %s1043_s15 = int_to_ptr.vmem [resolvable:$true] %s134_s15 }
  0x22   : > { %s124_s17 = scalar_lea.sflag [#allocation8], %s123_s8  ;;  %s793_s18 = scalar_lea.hbm %s1035_s13, 128 }
  0x23   : > { %p794_p5 = scmp.ne.s32.totalorder %s1035_s13, %s793_s18  ;;  %p795_p6 = pneg %p1039_p2 }
  0x24   : > { %s798_s21 = scalar_lea.hbm %s1290_s1, 256  ;;  %p799_p8 = scmp.lt.u32.totalorder %s1035_s13, %s1290_s1 }
  0x25   : > { %p796_p7 = pnand %p795_p6, %p794_p5  ;;  %p800_p11 = scmp.lt.u32.totalorder %s798_s21, %s793_s18 }
  0x26   : > { %p802_p12 = scmp.lt.u32.totalorder %s793_s18, %s1035_s13 }
  0x27   : > { %p797_p10 = pneg %p796_p7  ;;  %p801_p13 = por %p800_p11, %p799_p8 }
  0x29   : > { %p803_p3 = por %p802_p12, %p801_p13 }
  0x2b   : > { %p804_p4 = pnand %p803_p3, %p797_p10 }
  0x2d   : > { %807 = shalt.err (!%p804_p4)
}
  0x2e   : > { %s808_s29 = scalar_lea.vmem %s1043_s15, 128  ;;  %s934_s4 = smov [#allocation7]  }
  0x2f   : > { %p809_p5 = scmp.ne.s32.totalorder %s1043_s15, %s808_s29  ;;  %s813_s8 = sshll.u32 %s934_s4, 4  ;;  %s814_s8 = int_to_ptr.vmem [resolvable:$false] %s813_s8 }
  0x30   : > { %s815_s9 = scalar_lea.vmem %s814_s8, 256  ;;  %p816_p0 = scmp.lt.s32.totalorder %s1043_s15, %s814_s8 }
  0x31   : > { %p811_p7 = pnand %p809_p5, %p795_p6  ;;  %p817_p8 = scmp.lt.s32.totalorder %s815_s9, %s808_s29 }
  0x33   : > { %p812_p1 = pneg %p811_p7  ;;  %p818_p11 = por %p817_p8, %p816_p0 }
  0x35   : > { %p819_p12 = pnand %p818_p11, %p812_p1 }
  0x37   : > { %822 = shalt.err (!%p819_p12)
}
  0x38   : > { %723 = dma.hbm_to_vmem [thread:$0]  (!%p1039_p2), %s1035_s13, 128, %s1043_s15, %s124_s17  }
  0x39   : > { %p1299_p3 = scmp.lt.s32.totalorder %s927_s25, 3  ;;  %p1300_p4 = scmp.ge.s32.totalorder %s927_s25, 1 }
  0x3b   : > { %p140_p6 = pnand %p1300_p4, %p1299_p3 }
  0x3c   : > { %s1077_s10 = sand.u32 (!%p140_p6), 1, %s919_s23  }
  0x3d   : > { %143 = sbr.rel (%p140_p6) target bundleno = 4596 (0x11f4), region = 24  ;;  %s677_s11 = sshll.u32 (!%p140_p6), %s1077_s10, 3 }
  0x3e   : > { %s146_s12 = scalar_lea.sflag (!%p140_p6), [#allocation8], %s1077_s10  ;;  %s149_s14 = scalar_lea.vmem (!%p140_p6), [#allocation7], %s677_s11 }
  0x44   : > { %902 = dma.done.wait (%p1015_p9), %s146_s12, 128  }
  0x45   : > { %904 = vsyncadd (%p1015_p9), %s146_s12, 4294967168  ;;  %v194_v0 = vlaneseq  ;;  %s175_s13 = sld [smem:[#allocation6 + %s993_s0]]  ;;  %vm300_vm0 = vcmask 3072   ;;  %v935_v4 = vmov -1e+30   ;;  %vm181_vm2 = vcmask 261120  }
  0x46   : > { %s1094_s15 = scalar_lea.vmem [#allocation10], %s677_s11  ;;  %v1100_v6 = vld [vmem:[%s149_s14] sm:$0xff]  ;;  %s679_s5 = sshll.u32 %s1077_s10, 2 }
  0x47   : > { %v1086_v1 = vand.u32 127, %v194_v0  ;;  %v1088_v2 = vshrl.u32 %v194_v0, 7  ;;  %v182_v7 = vsel %vm181_vm2, %v1100_v6, -inf  ;;  %s1155_s16 = scalar_lea.vmem [#allocation11], %s679_s5 }
  0x48   : > { %183 = vmax.xlane.f32.xlu0 %v182_v7 }
  0x49   : > { %v294_v3 = vmul.u32 32, %v1086_v1  ;;  %vm298_vm1 = vcmp.eq.s32.totalorder %v1088_v2, 0  ;;  %vm213_vm8 = vcmp.eq.s32.totalorder %v1086_v1, 0  ;;  %vm238_vm9 = vcmp.eq.s32.totalorder %v1086_v1, 1 }
  0x4a   : > { %v299_v5 = vsel %vm298_vm1, 0.0, %v935_v4  ;;  %vm263_vm13 = vcmp.eq.s32.totalorder %v1086_v1, 2  ;;  %vm288_vm15 = vcmp.eq.s32.totalorder %v1086_v1, 3 }
  0x4b   : > { %295 = vst [vmem:[%s1094_s15] sm:$0xff] %v294_v3  ;;  %301 = vst.msk [vmem:[#allocation4] sm:$0xf] %vm300_vm0, %v299_v5  ;;  %p176_p9 = scmp.gt.s32.totalorder %s175_s13, 0  ;;  %p680_p0 = scmp.lt.s32.totalorder %s175_s13, 8 }
  0x4d   : > { %s1309_s13 = smov (!%p176_p9, %s175_s13), 0 }
  0x4e   : > { %s1311_s13 = smov (!%p680_p0, %s1309_s13), 8 }
  0x4f   : > { %p685_p1 = scmp.le.s32.totalorder %s1311_s13, 0 }
  0x50   : > { %s1158_s17 = smov (!%p685_p1), 0  }
  0xd5   : > { %v1106_v8 = vpop.xlane.xlu0 %183 }
  0xd6   : > { %vm196_vm3 = vcmp.eq.f32.partialorder %v1100_v6, %v1106_v8  ;;  %v185_v51 = vsub.f32 %v1100_v6, %v1106_v8  ;;  %v214_v63 = vsel %vm213_vm8, %v1106_v8, -1e+30 }
  0xd7   : > { %v197_v9 = vsel %vm196_vm3, %v1086_v1, 32  ;;  %vm291_vm3 = vcmask 31744  }
  0xd8   : > { %v198_v10 = vsel %vm181_vm2, %v197_v9, 2147483647  ;;  %v186_v52 = vmul.f32 1.442695, %v185_v51 }
  0xd9   : > { %v200_v11 = vshra.s32 %v198_v10, 16  ;;  %v199_v13 = vand.u32 65535, %v198_v10 }
  0xda   : > { %777 = vpow2.f32 %v186_v52 }
  0xdb   : > { %v202_v12 = vcvt.s32.f32 %v200_v11  ;;  %v201_v15 = vcvt.s32.f32 %v199_v13 }
  0xdd   : > { %203 = vmin.xlane.f32.xlu0 %v202_v12 }
  0xe4   : > { %v778_v61 = vpop.eup %777 }
  0xe5   : > { %v188_v62 = vsel %vm181_vm2, %v778_v61, 0.0 }
 0x16a   : > { %v204_v14 = vpop.xlane.xlu0 %203 }
 0x16b   : > { %vm205_vm4 = vcmp.eq.f32.partialorder %v202_v12, %v204_v14  ;;  %v210_v17 = vcvt.f32.s32 %v204_v14 }
 0x16c   : > { %v206_v16 = vsel %vm205_vm4, %v201_v15, inf }
 0x16d   : > { %207 = vmin.xlane.f32.xlu1 %v206_v16  ;;  %v211_v19 = vshll.u32 %v210_v17, 16 }
 0x1fa   : > { %v208_v18 = vpop.xlane.xlu1 %207 }
 0x1fb   : > { %v209_v20 = vcvt.f32.s32 %v208_v18 }
 0x1fd   : > { %v212_v21 = vadd.s32 %v211_v19, %v209_v20 }
 0x1ff   : > { %vm216_vm5 = vcmp.eq.s32.totalorder %v1086_v1, %v212_v21  ;;  %v215_v38 = vsel %vm213_vm8, %v212_v21, 0 }
 0x200   : > { %v217_v22 = vsel %vm216_vm5, -1e+30, %v1100_v6 }
 0x201   : > { %v218_v23 = vsel %vm181_vm2, %v217_v22, -inf }
 0x202   : > { %219 = vmax.xlane.f32.xlu1 %v218_v23 }
 0x28f   : > { %v220_v24 = vpop.xlane.xlu1 %219 }
 0x290   : > { %vm221_vm6 = vcmp.eq.f32.partialorder %v217_v22, %v220_v24  ;;  %v239_v0 = vsel %vm238_vm9, %v220_v24, %v214_v63 }
 0x291   : > { %v222_v25 = vsel %vm221_vm6, %v1086_v1, 32 }
 0x292   : > { %v223_v26 = vsel %vm181_vm2, %v222_v25, 2147483647 }
 0x293   : > { %v225_v27 = vshra.s32 %v223_v26, 16  ;;  %v224_v29 = vand.u32 65535, %v223_v26 }
 0x295   : > { %v227_v28 = vcvt.s32.f32 %v225_v27  ;;  %v226_v31 = vcvt.s32.f32 %v224_v29 }
 0x297   : > { %228 = vmin.xlane.f32.xlu0 %v227_v28 }
 0x324   : > { %v229_v30 = vpop.xlane.xlu0 %228 }
 0x325   : > { %vm230_vm7 = vcmp.eq.f32.partialorder %v227_v28, %v229_v30  ;;  %v235_v33 = vcvt.f32.s32 %v229_v30 }
 0x326   : > { %v231_v32 = vsel %vm230_vm7, %v226_v31, inf }
 0x327   : > { %232 = vmin.xlane.f32.xlu1 %v231_v32  ;;  %v236_v35 = vshll.u32 %v235_v33, 16 }
 0x3b4   : > { %v233_v34 = vpop.xlane.xlu1 %232 }
 0x3b5   : > { %v234_v36 = vcvt.f32.s32 %v233_v34 }
 0x3b7   : > { %v237_v37 = vadd.s32 %v236_v35, %v234_v36 }
 0x3b9   : > { %v240_v39 = vsel %vm238_vm9, %v237_v37, %v215_v38  ;;  %vm241_vm10 = vcmp.eq.s32.totalorder %v1086_v1, %v237_v37 }
 0x3ba   : > { %v242_v40 = vsel %vm241_vm10, -1e+30, %v217_v22 }
 0x3bb   : > { %v243_v41 = vsel %vm181_vm2, %v242_v40, -inf }
 0x3bc   : > { %244 = vmax.xlane.f32.xlu0 %v243_v41 }
 0x449   : > { %v245_v42 = vpop.xlane.xlu0 %244 }
 0x44a   : > { %vm246_vm11 = vcmp.eq.f32.partialorder %v242_v40, %v245_v42  ;;  %v264_v4 = vsel %vm263_vm13, %v245_v42, %v239_v0 }
 0x44b   : > { %v247_v43 = vsel %vm246_vm11, %v1086_v1, 32 }
 0x44c   : > { %v248_v44 = vsel %vm181_vm2, %v247_v43, 2147483647 }
 0x44d   : > { %v250_v45 = vshra.s32 %v248_v44, 16  ;;  %v249_v47 = vand.u32 65535, %v248_v44 }
 0x44f   : > { %v252_v46 = vcvt.s32.f32 %v250_v45  ;;  %v251_v49 = vcvt.s32.f32 %v249_v47 }
 0x451   : > { %253 = vmin.xlane.f32.xlu1 %v252_v46 }
 0x4de   : > { %v254_v48 = vpop.xlane.xlu1 %253 }
 0x4df   : > { %vm255_vm12 = vcmp.eq.f32.partialorder %v252_v46, %v254_v48  ;;  %v260_v53 = vcvt.f32.s32 %v254_v48 }
 0x4e0   : > { %v256_v50 = vsel %vm255_vm12, %v251_v49, inf }
 0x4e1   : > { %257 = vmin.xlane.f32.xlu0 %v256_v50  ;;  %v261_v55 = vshll.u32 %v260_v53, 16 }
 0x56e   : > { %v258_v54 = vpop.xlane.xlu0 %257 }
 0x56f   : > { %v259_v56 = vcvt.f32.s32 %v258_v54 }
 0x571   : > { %v262_v57 = vadd.s32 %v261_v55, %v259_v56 }
 0x573   : > { %v265_v58 = vsel %vm263_vm13, %v262_v57, %v240_v39  ;;  %vm266_vm14 = vcmp.eq.s32.totalorder %v1086_v1, %v262_v57 }
 0x574   : > { %v267_v59 = vsel %vm266_vm14, -1e+30, %v242_v40 }
 0x575   : > { %v268_v60 = vsel %vm181_vm2, %v267_v59, -inf }
 0x576   : > { %269 = vmax.xlane.f32.xlu1 %v268_v60 }
 0x57a   : > { %189 = vadd.xlane.f32.xlu1 %v188_v62 }
 0x603   : > { %v270_v5 = vpop.xlane.xlu1 %269 }
 0x604   : > { %vm271_vm4 = vcmp.eq.f32.partialorder %v267_v59, %v270_v5  ;;  %v289_v6 = vsel %vm288_vm15, %v270_v5, %v264_v4 }
 0x605   : > { %v272_v7 = vsel %vm271_vm4, %v1086_v1, 32  ;;  %292 = vst.msk [vmem:[#allocation2] sm:$0xff] %vm291_vm3, %v289_v6 }
 0x606   : > { %v273_v9 = vsel %vm181_vm2, %v272_v7, 2147483647 }
 0x607   : > { %v190_v10 = vpop.xlane.xlu1 %189  ;;  %v275_v11 = vshra.s32 %v273_v9, 16  ;;  %v274_v16 = vand.u32 65535, %v273_v9 }
 0x608   : > { %779 = vlog2.f32 %v190_v10 }
 0x609   : > { %v277_v12 = vcvt.s32.f32 %v275_v11  ;;  %v276_v18 = vcvt.s32.f32 %v274_v16 }
 0x60b   : > { %278 = vmin.xlane.f32.xlu0 %v277_v12 }
 0x612   : > { %v780_v13 = vpop.eup %779 }
 0x613   : > { %v192_v14 = vmul.f32 0.6931472, %v780_v13 }
 0x615   : > { %v1149_v15 = vadd.f32 %v192_v14, %v1106_v8 }
 0x698   : > { %v279_v17 = vpop.xlane.xlu0 %278 }
 0x699   : > { %vm280_vm5 = vcmp.eq.f32.partialorder %v277_v12, %v279_v17  ;;  %v285_v20 = vcvt.f32.s32 %v279_v17 }
 0x69a   : > { %v281_v19 = vsel %vm280_vm5, %v276_v18, inf }
 0x69b   : > { %282 = vmin.xlane.f32.xlu0 %v281_v19  ;;  %v286_v22 = vshll.u32 %v285_v20, 16 }
 0x728   : > { %v283_v21 = vpop.xlane.xlu0 %282  ;;  %635 = sbr.rel (%p685_p1) target bundleno = 4243 (0x1093), region = 90 }
 0x729   : > { %v284_v23 = vcvt.f32.s32 %v283_v21 }
 0x72b   : > { %v287_v24 = vadd.s32 %v286_v22, %v284_v23 }
 0x72d   : > { %v290_v25 = vsel %vm288_vm15, %v287_v24, %v265_v58 }
 0x72e   : > { %293 = vst.msk [vmem:[#allocation3] sm:$0xff] %vm291_vm3, %v290_v25 }
 0x72f LB: >> { %v312_v8 = vld [vmem:[#allocation4] sm:$0xf]  ;;  %v936_v26 = vmov 0   ;;  %s308_s18 = scalar_lea.vmem [#allocation2], %s931_s17  ;;  %vm329_vm2 = vcmask 27648   ;;  %v323_v38 = vmul.u32 32, %v1088_v2  ;;  %s504_s11 = scalar_lea.vmem %s1094_s15, %s931_s17 [#allocation10]  ;;  %s931_s17 = sphi %s1158_s17, %s305_s17  }
 0x730   : >> { %781 = vset.pattern.permute.xlu0 %v936_v26  ;;  %v686_v27 = vld [vmem:[%s308_s18] ss:$0 sm:$0xff]  ;;  %s310_s19 = scalar_lea.vmem [#allocation3], %s931_s17  ;;  %vm413_vm3 = vcmp.eq.s32.totalorder %v1088_v2, 1  ;;  %s305_s17 = sadd.s32 1, %s931_s17  }
 0x731   : >> { %315 = vperm.xlu0 %781, %v312_v8   ;;  %p304_p2 = scmp.ge.s32.totalorder %s305_s17, %s1311_s13 }
 0x735   : >> { %v687_v39 = vld [vmem:[%s310_s19] ss:$0 sm:$0xff] }
 0x736   : >> { %v1167_v40 = vadd.s32 %v687_v39, %v323_v38 }
 0x7b0   : >> { %v316_v28 = vpop.permute.xlu0 %315 }
 0x7b1   : >> { %v322_v29 = vadd.f32 %v686_v27, %v316_v28 }
 0x7b3   : >> { %v330_v30 = vsel %vm329_vm2, %v322_v29, -inf }
 0x7b4   : >> { %331 = vmax.xlane.f32.xlu0 %v330_v30 }
 0x841   : >> { %v332_v31 = vpop.xlane.xlu0 %331 }
 0x842   : >> { %v333_v32 = vrot.slane %v332_v31, 4 }
 0x844   : >> { %v334_v33 = vmax.f32 %v332_v31, %v333_v32 }
 0x846   : >> { %v335_v34 = vrot.slane %v334_v33, 2 }
 0x848   : >> { %v336_v35 = vmax.f32 %v334_v33, %v335_v34 }
 0x84a   : >> { %v337_v36 = vrot.slane %v336_v35, 1 }
 0x84c   : >> { %v338_v37 = vmax.f32 %v336_v35, %v337_v36 }
 0x84e   : >> { %696 = vpush %v338_v37 }
 0x87f   : >> { %s1169_s20 = spop %696 }
 0x880   : >> { %v340_v41 = vstv %s1169_s20 }
 0x881   : >> { %vm341_vm6 = vcmp.eq.f32.partialorder %v322_v29, %v340_v41  ;;  %v370_v11 = vsel %vm298_vm1, %v340_v41, -1e+30 }
 0x882   : >> { %v342_v42 = vsel %vm341_vm6, %v1167_v40, 128 }
 0x883   : >> { %v343_v43 = vsel %vm329_vm2, %v342_v42, 2147483647 }
 0x884   : >> { %v345_v44 = vshra.s32 %v343_v43, 16  ;;  %v344_v46 = vand.u32 65535, %v343_v43 }
 0x886   : >> { %v347_v45 = vcvt.s32.f32 %v345_v44  ;;  %v346_v48 = vcvt.s32.f32 %v344_v46 }
 0x888   : >> { %348 = vmin.xlane.f32.xlu1 %v347_v45 }
 0x915   : >> { %v349_v47 = vpop.xlane.xlu1 %348 }
 0x916   : >> { %vm350_vm7 = vcmp.eq.f32.partialorder %v347_v45, %v349_v47  ;;  %v355_v50 = vcvt.f32.s32 %v349_v47 }
 0x917   : >> { %v351_v49 = vsel %vm350_vm7, %v346_v48, inf }
 0x918   : >> { %352 = vmin.xlane.f32.xlu1 %v351_v49  ;;  %v356_v52 = vshll.u32 %v355_v50, 16 }
 0x9a5   : >> { %v353_v51 = vpop.xlane.xlu1 %352 }
 0x9a6   : >> { %v354_v53 = vcvt.f32.s32 %v353_v51 }
 0x9a8   : >> { %v357_v54 = vadd.s32 %v356_v52, %v354_v53 }
 0x9aa   : >> { %v358_v55 = vrot.slane %v357_v54, 4 }
 0x9ac   : >> { %vm359_vm10 = vcmp.lt.s32.totalorder %v357_v54, %v358_v55 }
 0x9ad   : >> { %v360_v56 = vsel %vm359_vm10, %v357_v54, %v358_v55 }
 0x9ae   : >> { %v361_v57 = vrot.slane %v360_v56, 2 }
 0x9b0   : >> { %vm362_vm11 = vcmp.lt.s32.totalorder %v360_v56, %v361_v57 }
 0x9b1   : >> { %v363_v58 = vsel %vm362_vm11, %v360_v56, %v361_v57 }
 0x9b2   : >> { %v364_v59 = vrot.slane %v363_v58, 1 }
 0x9b4   : >> { %vm365_vm12 = vcmp.lt.s32.totalorder %v363_v58, %v364_v59 }
 0x9b5   : >> { %v366_v60 = vsel %vm365_vm12, %v363_v58, %v364_v59  ;;  %vm457_vm12 = vcmp.eq.s32.totalorder %v1088_v2, 2 }
 0x9b6   : >> { %698 = vpush %v366_v60 }
 0x9e7   : >> { %s1174_s21 = spop %698 }
 0x9e8   : >> { %v368_v61 = vstv %s1174_s21 }
 0x9e9   : >> { %vm371_vm14 = vcmp.eq.s32.totalorder %v1167_v40, %v368_v61  ;;  %v369_v33 = vsel %vm213_vm8, %v368_v61, %v294_v3 }
 0x9ea   : >> { %v372_v62 = vsel %vm371_vm14, -1e+30, %v322_v29 }
 0x9eb   : >> { %v373_v63 = vsel %vm329_vm2, %v372_v62, -inf }
 0x9ec   : >> { %374 = vmax.xlane.f32.xlu1 %v373_v63 }
 0xa79   : >> { %v375_v0 = vpop.xlane.xlu1 %374 }
 0xa7a   : >> { %v376_v4 = vrot.slane %v375_v0, 4 }
 0xa7c   : >> { %v377_v5 = vmax.f32 %v375_v0, %v376_v4 }
 0xa7e   : >> { %v378_v6 = vrot.slane %v377_v5, 2 }
 0xa80   : >> { %v379_v7 = vmax.f32 %v377_v5, %v378_v6 }
 0xa82   : >> { %v380_v9 = vrot.slane %v379_v7, 1 }
 0xa84   : >> { %v381_v10 = vmax.f32 %v379_v7, %v380_v9 }
 0xa86   : >> { %700 = vpush %v381_v10 }
 0xab7   : >> { %s701_s26 = spop %700 }
 0xab8   : >> { %v383_v12 = vstv %s701_s26 }
 0xab9   : >> { %vm384_vm4 = vcmp.eq.f32.partialorder %v372_v62, %v383_v12  ;;  %v414_v13 = vsel %vm413_vm3, %v383_v12, %v370_v11 }
 0xaba   : >> { %v385_v14 = vsel %vm384_vm4, %v1167_v40, 128 }
 0xabb   : >> { %v386_v16 = vsel %vm329_vm2, %v385_v14, 2147483647 }
 0xabc   : >> { %v388_v17 = vshra.s32 %v386_v16, 16  ;;  %v387_v19 = vand.u32 65535, %v386_v16 }
 0xabe   : >> { %v390_v18 = vcvt.s32.f32 %v388_v17  ;;  %v389_v21 = vcvt.s32.f32 %v387_v19 }
 0xac0   : >> { %391 = vmin.xlane.f32.xlu1 %v390_v18 }
 0xb4d   : >> { %v392_v20 = vpop.xlane.xlu1 %391 }
 0xb4e   : >> { %vm393_vm5 = vcmp.eq.f32.partialorder %v390_v18, %v392_v20  ;;  %v398_v23 = vcvt.f32.s32 %v392_v20 }
 0xb4f   : >> { %v394_v22 = vsel %vm393_vm5, %v389_v21, inf }
 0xb50   : >> { %395 = vmin.xlane.f32.xlu1 %v394_v22  ;;  %v399_v25 = vshll.u32 %v398_v23, 16 }
 0xbdd   : >> { %v396_v24 = vpop.xlane.xlu1 %395 }
 0xbde   : >> { %v397_v8 = vcvt.f32.s32 %v396_v24 }
 0xbe0   : >> { %v400_v26 = vadd.s32 %v399_v25, %v397_v8 }
 0xbe2   : >> { %v401_v27 = vrot.slane %v400_v26, 4 }
 0xbe4   : >> { %vm402_vm6 = vcmp.lt.s32.totalorder %v400_v26, %v401_v27 }
 0xbe5   : >> { %v403_v28 = vsel %vm402_vm6, %v400_v26, %v401_v27 }
 0xbe6   : >> { %v404_v29 = vrot.slane %v403_v28, 2 }
 0xbe8   : >> { %vm405_vm7 = vcmp.lt.s32.totalorder %v403_v28, %v404_v29 }
 0xbe9   : >> { %v406_v30 = vsel %vm405_vm7, %v403_v28, %v404_v29 }
 0xbea   : >> { %v407_v31 = vrot.slane %v406_v30, 1 }
 0xbec   : >> { %vm408_vm10 = vcmp.lt.s32.totalorder %v406_v30, %v407_v31 }
 0xbed   : >> { %v409_v32 = vsel %vm408_vm10, %v406_v30, %v407_v31  ;;  %vm501_vm10 = vcmp.eq.s32.totalorder %v1088_v2, 3 }
 0xbee   : >> { %702 = vpush %v409_v32 }
 0xc1f   : >> { %s703_s28 = spop %702 }
 0xc20   : >> { %v411_v34 = vstv %s703_s28 }
 0xc21   : >> { %v412_v35 = vsel %vm238_vm9, %v411_v34, %v369_v33  ;;  %vm415_vm11 = vcmp.eq.s32.totalorder %v1167_v40, %v411_v34 }
 0xc22   : >> { %v416_v36 = vsel %vm415_vm11, -1e+30, %v372_v62 }
 0xc23   : >> { %v417_v37 = vsel %vm329_vm2, %v416_v36, -inf }
 0xc24   : >> { %418 = vmax.xlane.f32.xlu1 %v417_v37 }
 0xcb1   : >> { %v419_v38 = vpop.xlane.xlu1 %418 }
 0xcb2   : >> { %v420_v39 = vrot.slane %v419_v38, 4 }
 0xcb4   : >> { %v421_v41 = vmax.f32 %v419_v38, %v420_v39 }
 0xcb6   : >> { %v422_v42 = vrot.slane %v421_v41, 2 }
 0xcb8   : >> { %v423_v43 = vmax.f32 %v421_v41, %v422_v42 }
 0xcba   : >> { %v424_v44 = vrot.slane %v423_v43, 1 }
 0xcbc   : >> { %v425_v45 = vmax.f32 %v423_v43, %v424_v44 }
 0xcbe   : >> { %704 = vpush %v425_v45 }
 0xcef   : >> { %s705_s29 = spop %704 }
 0xcf0   : >> { %v427_v46 = vstv %s705_s29 }
 0xcf1   : >> { %vm428_vm14 = vcmp.eq.f32.partialorder %v416_v36, %v427_v46  ;;  %v458_v47 = vsel %vm457_vm12, %v427_v46, %v414_v13 }
 0xcf2   : >> { %v429_v48 = vsel %vm428_vm14, %v1167_v40, 128 }
 0xcf3   : >> { %v430_v49 = vsel %vm329_vm2, %v429_v48, 2147483647 }
 0xcf4   : >> { %v432_v50 = vshra.s32 %v430_v49, 16  ;;  %v431_v52 = vand.u32 65535, %v430_v49 }
 0xcf6   : >> { %v434_v51 = vcvt.s32.f32 %v432_v50  ;;  %v433_v54 = vcvt.s32.f32 %v431_v52 }
 0xcf8   : >> { %435 = vmin.xlane.f32.xlu1 %v434_v51 }
 0xd85   : >> { %v436_v53 = vpop.xlane.xlu1 %435 }
 0xd86   : >> { %vm437_vm3 = vcmp.eq.f32.partialorder %v434_v51, %v436_v53  ;;  %v442_v56 = vcvt.f32.s32 %v436_v53 }
 0xd87   : >> { %v438_v55 = vsel %vm437_vm3, %v433_v54, inf }
 0xd88   : >> { %439 = vmin.xlane.f32.xlu1 %v438_v55  ;;  %v443_v58 = vshll.u32 %v442_v56, 16 }
 0xe15   : >> { %v440_v57 = vpop.xlane.xlu1 %439 }
 0xe16   : >> { %v441_v59 = vcvt.f32.s32 %v440_v57 }
 0xe18   : >> { %v444_v60 = vadd.s32 %v443_v58, %v441_v59 }
 0xe1a   : >> { %v445_v61 = vrot.slane %v444_v60, 4 }
 0xe1c   : >> { %vm446_vm4 = vcmp.lt.s32.totalorder %v444_v60, %v445_v61 }
 0xe1d   : >> { %v447_v62 = vsel %vm446_vm4, %v444_v60, %v445_v61 }
 0xe1e   : >> { %v448_v63 = vrot.slane %v447_v62, 2 }
 0xe20   : >> { %vm449_vm5 = vcmp.lt.s32.totalorder %v447_v62, %v448_v63 }
 0xe21   : >> { %v450_v0 = vsel %vm449_vm5, %v447_v62, %v448_v63 }
 0xe22   : >> { %v451_v4 = vrot.slane %v450_v0, 1 }
 0xe24   : >> { %vm452_vm6 = vcmp.lt.s32.totalorder %v450_v0, %v451_v4 }
 0xe25   : >> { %v453_v5 = vsel %vm452_vm6, %v450_v0, %v451_v4 }
 0xe26   : >> { %706 = vpush %v453_v5 }
 0xe57   : >> { %s707_s4 = spop %706 }
 0xe58   : >> { %v455_v6 = vstv %s707_s4 }
 0xe59   : >> { %v456_v7 = vsel %vm263_vm13, %v455_v6, %v412_v35  ;;  %vm459_vm7 = vcmp.eq.s32.totalorder %v1167_v40, %v455_v6 }
 0xe5a   : >> { %v460_v9 = vsel %vm459_vm7, -1e+30, %v416_v36 }
 0xe5b   : >> { %v461_v10 = vsel %vm329_vm2, %v460_v9, -inf }
 0xe5c   : >> { %462 = vmax.xlane.f32.xlu1 %v461_v10 }
 0xee9   : >> { %v463_v11 = vpop.xlane.xlu1 %462 }
 0xeea   : >> { %v464_v12 = vrot.slane %v463_v11, 4 }
 0xeec   : >> { %v465_v13 = vmax.f32 %v463_v11, %v464_v12 }
 0xeee   : >> { %v466_v14 = vrot.slane %v465_v13, 2 }
 0xef0   : >> { %v467_v16 = vmax.f32 %v465_v13, %v466_v14 }
 0xef2   : >> { %v468_v17 = vrot.slane %v467_v16, 1 }
 0xef4   : >> { %v469_v18 = vmax.f32 %v467_v16, %v468_v17 }
 0xef6   : >> { %708 = vpush %v469_v18 }
 0xf27   : >> { %s709_s8 = spop %708 }
 0xf28   : >> { %v471_v19 = vstv %s709_s8 }
 0xf29   : >> { %vm472_vm11 = vcmp.eq.f32.partialorder %v460_v9, %v471_v19  ;;  %v502_v20 = vsel %vm501_vm10, %v471_v19, %v458_v47 }
 0xf2a   : >> { %v473_v21 = vsel %vm472_vm11, %v1167_v40, 128  ;;  %503 = vst.msk [vmem:[#allocation4] sm:$0xf] %vm300_vm0, %v502_v20 }
 0xf2b   : >> { %v474_v22 = vsel %vm329_vm2, %v473_v21, 2147483647 }
 0xf2c   : >> { %v476_v23 = vshra.s32 %v474_v22, 16  ;;  %v475_v25 = vand.u32 65535, %v474_v22 }
 0xf2e   : >> { %v478_v24 = vcvt.s32.f32 %v476_v23  ;;  %v477_v26 = vcvt.s32.f32 %v475_v25 }
 0xf30   : >> { %479 = vmin.xlane.f32.xlu0 %v478_v24 }
 0xfbd   : >> { %v480_v8 = vpop.xlane.xlu0 %479 }
 0xfbe   : >> { %vm481_vm12 = vcmp.eq.f32.partialorder %v478_v24, %v480_v8  ;;  %v486_v28 = vcvt.f32.s32 %v480_v8 }
 0xfbf   : >> { %v482_v27 = vsel %vm481_vm12, %v477_v26, inf }
 0xfc0   : >> { %483 = vmin.xlane.f32.xlu1 %v482_v27  ;;  %v487_v30 = vshll.u32 %v486_v28, 16 }
0x104d   : >> { %v484_v29 = vpop.xlane.xlu1 %483 }
0x104e   : >> { %v485_v31 = vcvt.f32.s32 %v484_v29 }
0x1050   : >> { %v488_v40 = vadd.s32 %v487_v30, %v485_v31 }
0x1052   : >> { %v489_v32 = vrot.slane %v488_v40, 4 }
0x1054   : >> { %vm490_vm14 = vcmp.lt.s32.totalorder %v488_v40, %v489_v32 }
0x1055   : >> { %v491_v33 = vsel %vm490_vm14, %v488_v40, %v489_v32 }
0x1056   : >> { %v492_v34 = vrot.slane %v491_v33, 2 }
0x1058   : >> { %vm493_vm2 = vcmp.lt.s32.totalorder %v491_v33, %v492_v34 }
0x1059   : >> { %v494_v35 = vsel %vm493_vm2, %v491_v33, %v492_v34 }
0x105a   : >> { %v495_v36 = vrot.slane %v494_v35, 1 }
0x105c   : >> { %vm496_vm3 = vcmp.lt.s32.totalorder %v494_v35, %v495_v36 }
0x105d   : >> { %v497_v37 = vsel %vm496_vm3, %v494_v35, %v495_v36 }
0x105e   : >> { %710 = vpush %v497_v37 }
0x108c   : > { %307 = sbr.rel (!%p304_p2) target bundleno = 1839 (0x72f), region = 96 }
0x108f   : >> { %s711_s9 = spop %710 }
0x1090   : >> { %v499_v38 = vstv %s711_s9 }
0x1091   : >> { %v500_v39 = vsel %vm288_vm15, %v499_v38, %v456_v7 }
0x1092   : >> { %505 = vst [vmem:[%s504_s11] sm:$0x1] %v500_v39 }
0x1093 PF: > { %v506_v41 = vstv %s1311_s13  ;;  %vm509_vm4 = vcmask 7168   ;;  %v937_v44 = vmov 0   ;;  %v520_v50 = vld [vmem:[#allocation4] sm:$0xf]  ;;  %s690_s14 = sshll.u32 %s993_s0, 7  ;;  %s548_s13 = sshll.u32 %s1094_s15, 4  ;;  %s549_s13 = int_to_ptr.vmem [resolvable:$true] %s548_s13 }
0x1094   : > { %vm507_vm5 = vcmp.lt.s32.totalorder %v1088_v2, %v506_v41  ;;  %782 = vset.pattern.permute.xlu0 %v937_v44  ;;  %s1219_s18 = scalar_lea.hbm %s1291_s2, %s690_s14  ;;  %s530_s19 = scalar_lea.sflag [#allocation9], %s1077_s10 }
0x1095   : > { %v508_v42 = vsel %vm507_vm5, %v1149_v15, 0.0  ;;  %s823_s20 = scalar_lea.vmem %s549_s13, 128  ;;  %p1301_p13 = scmp.ne.s32.totalorder %s1296_s6, 0 }
0x1096   : > { %v510_v43 = vsel %vm509_vm4, %v508_v42, 0.0  ;;  %p824_p10 = scmp.ne.s32.totalorder %s549_s13, %s823_s20  ;;  %s938_s21 = smov [#allocation10]  }
0x1097   : > { %511 = vadd.xlane.f32.xlu0 %v510_v43  ;;  %s827_s26 = sshll.u32 %s938_s21, 4  ;;  %s828_s26 = int_to_ptr.vmem [resolvable:$false] %s827_s26 }
0x1098   : > { %p825_p5 = pnand %p824_p10, %p1301_p13  ;;  %s829_s28 = scalar_lea.vmem %s828_s26, 256 }
0x1099   : > { %p830_p8 = scmp.lt.s32.totalorder %s549_s13, %s828_s26  ;;  %p831_p11 = scmp.lt.s32.totalorder %s829_s28, %s823_s20 }
0x109a   : > { %p826_p7 = pneg %p825_p5 }
0x109b   : > { %p832_p12 = por %p831_p11, %p830_p8 }
0x109d   : > { %p833_p3 = pnand %p832_p12, %p826_p7 }
0x1124   : > { %v512_v45 = vpop.xlane.xlu0 %511 }
0x1125   : > { %v513_v46 = vrot.slane %v512_v45, 4 }
0x1127   : > { %v514_v47 = vadd.f32 %v513_v46, %v512_v45 }
0x1129   : > { %v515_v48 = vrot.slane %v514_v47, 2 }
0x112b   : > { %v516_v49 = vadd.f32 %v515_v48, %v514_v47 }
0x112d   : > { %v517_v1 = vrot.slane %v516_v49, 1 }
0x112f   : > { %v518_v3 = vadd.f32 %v517_v1, %v516_v49 }
0x1131   : > { %712 = vpush %v518_v3 }
0x1162   : > { %s713_s12 = spop %712 }
0x1163   : > { %v521_v2 = vstv %s713_s12 }
0x1164   : > { %v522_v15 = vsub.f32 %v520_v50, %v521_v2 }
0x1166   : > { %525 = vperm.xlu0 %782, %v522_v15  }
0x1167   : > { %836 = shalt.err (!%p833_p3)
}
0x1168   : > { %s837_s15 = scalar_lea.hbm %s1219_s18, 128  ;;  %s841_s8 = scalar_lea.hbm %s1291_s2, 256 }
0x1169   : > { %p838_p4 = scmp.ne.s32.totalorder %s1219_s18, %s837_s15  ;;  %p842_p0 = scmp.lt.u32.totalorder %s1219_s18, %s1291_s2 }
0x116a   : > { %p843_p1 = scmp.lt.u32.totalorder %s841_s8, %s837_s15  ;;  %p845_p10 = scmp.lt.u32.totalorder %s837_s15, %s1219_s18 }
0x116b   : > { %p839_p6 = pnand %p838_p4, %p1301_p13 }
0x116c   : > { %p844_p2 = por %p843_p1, %p842_p0 }
0x116d   : > { %p840_p9 = pneg %p839_p6 }
0x116e   : > { %p846_p5 = por %p845_p10, %p844_p2 }
0x1170   : > { %p847_p7 = pnand %p846_p5, %p840_p9 }
0x1172   : > { %850 = shalt.err (!%p847_p7)
}
0x1173   : > { %716 = dma.vmem_to_hbm [thread:$0]  (%p1301_p13), %s549_s13, 128, %s1219_s18, %s530_s19  }
0x1174   : > { %s691_s12 = sshll.u32 %s993_s0, 6  ;;  %s561_s14 = sshll.u32 %s1155_s16, 4  ;;  %s1246_s14 = int_to_ptr.vmem [resolvable:$true] %s561_s14 }
0x1175   : > { %s1244_s20 = scalar_lea.hbm %s1292_s3, %s691_s12  ;;  %s535_s21 = scalar_lea.sflag [#allocation12], %s1077_s10 }
0x1176   : > { %s851_s26 = scalar_lea.vmem %s1246_s14, 64  ;;  %s939_s0 = smov [#allocation11]  }
0x1177   : > { %p852_p8 = scmp.ne.s32.totalorder %s1246_s14, %s851_s26  ;;  %s855_s13 = sshll.u32 %s939_s0, 4  ;;  %s856_s13 = int_to_ptr.vmem [resolvable:$false] %s855_s13 }
0x1178   : > { %s857_s18 = scalar_lea.vmem %s856_s13, 128  ;;  %p858_p3 = scmp.lt.s32.totalorder %s1246_s14, %s856_s13 }
0x1179   : > { %p853_p11 = pnand %p852_p8, %p1301_p13  ;;  %p859_p4 = scmp.lt.s32.totalorder %s857_s18, %s851_s26 }
0x117b   : > { %p854_p12 = pneg %p853_p11  ;;  %p860_p6 = por %p859_p4, %p858_p3 }
0x117d   : > { %p861_p9 = pnand %p860_p6, %p854_p12 }
0x11e5   : > { %v526_v51 = vpop.permute.xlu0 %525 }
0x11e6   : > { %528 = vst [vmem:[%s1155_s16] sm:$0xf] %v526_v51 }
0x11e7   : > { %864 = shalt.err (!%p861_p9)
}
0x11e8   : > { %s865_s10 = scalar_lea.hbm %s1244_s20, 64  ;;  %s869_s28 = scalar_lea.hbm %s1292_s3, 128 }
0x11e9   : > { %p866_p0 = scmp.ne.s32.totalorder %s1244_s20, %s865_s10  ;;  %p870_p10 = scmp.lt.u32.totalorder %s1244_s20, %s1292_s3 }
0x11ea   : > { %p871_p5 = scmp.lt.u32.totalorder %s869_s28, %s865_s10  ;;  %p873_p8 = scmp.lt.u32.totalorder %s865_s10, %s1244_s20 }
0x11eb   : > { %p867_p1 = pnand %p866_p0, %p1301_p13 }
0x11ec   : > { %p872_p7 = por %p871_p5, %p870_p10 }
0x11ed   : > { %p868_p2 = pneg %p867_p1 }
0x11ee   : > { %p874_p11 = por %p873_p8, %p872_p7 }
0x11f0   : > { %p875_p12 = pnand %p874_p11, %p868_p2 }
0x11f2   : > { %878 = shalt.err (!%p875_p12)
}
0x11f3   : > { %717 = dma.vmem_to_hbm [thread:$0]  (%p1301_p13), %s1246_s14, 64, %s1244_s20, %s535_s21  }
0x11f4 PF: > { %s573_s4 = sand.u32 1, %s915_s22   ;;  %p1302_p3 = scmp.ne.s32.totalorder %s1297_s7, 0 }
0x11f5   : > { %p1303_p4 = scmp.ge.s32.totalorder %s927_s25, 2  ;;  %s574_s8 = scalar_lea.sflag [#allocation9], %s573_s4 }
0x11f7   : > { %p725_p6 = pnand %p1303_p4, %p1302_p3 }
0x11f9   : > { %906 = dma.done.wait (!%p725_p6), %s574_s8, 128  }
0x11fa   : > { %908 = vsyncadd (!%p725_p6), %s574_s8, 4294967168  ;;  %s583_s9 = scalar_lea.sflag [#allocation12], %s573_s4 }
0x11fb   : > { %910 = dma.done.wait (!%p725_p6), %s583_s9, 64  }
0x11fc   : > { %912 = vsyncadd (!%p725_p6), %s583_s9, 4294967232  ;;  %p24_p13 = scmp.ge.s32.totalorder %s997_s27, 4   ;;  %s1304_s22 = smov %s919_s23 }
0x11fd   : > { %s1305_s23 = smov %s923_s24  ;;  %s1306_s24 = smov %s1009_s30 }
0x11fe   : > { %s1307_s25 = smov %s997_s27  ;;  %26 = sbr.rel (!%p24_p13) target bundleno = 19 (0x13), region = 107 }
0x1205   :  { %588 = vsyncpa [#allocation8], 1 }
0x1206   :  { %590 = vsyncpa [#allocation8 + $0x1], 1 }
0x1207   :  { %591 = vsyncpa [#allocation9], 1 }
0x1208   :  { %593 = vsyncpa [#allocation9 + $0x1], 1 }
0x1209   :  { %594 = vsyncpa [#allocation12], 1 }
0x120a   :  { %596 = vsyncpa [#allocation12 + $0x1], 1 }

</bundles_post_ra>
